<compile_context>
chip_gen: v7x
topology: tpu7x:2x2x1
jax: 0.10.0
libtpu: 0.0.40
codegen_flags: <defaults>
</compile_context>

<pallas_src>
import functools
import math

import jax
import jax.numpy as jnp
from jax.experimental import pallas as pl
from jax.experimental.pallas import tpu as pltpu

LANE = 128


def _round_up(x, m):
    return ((x + m - 1) // m) * m


def _mlp_actor_kernel(n_pi, act_limit, ln_eps, state_dim, pi_dims,
                      obs_ref, wtr_ref, bias_ref, *rest):
    """Fused MLPActor forward (deterministic path), one batch tile per step.

    rest = (piW_0, ..., piW_{n_pi-1}, mu_ref)

    bias_ref is a packed (P, 128+) array:
      row 0 = trunk bias, row 1 = LN gamma, row 2 = LN beta,
      rows 3.. = pi layer biases (last one zero-padded to the padded out dim).
    """
    pi_w_refs = rest[:n_pi]
    mu_ref = rest[n_pi]

    x = obs_ref[...]                                   # (TB, repr_dim) f32

    # ---- trunk: Linear(repr_dim -> state_dim) ----
    h = jnp.dot(x, wtr_ref[...], preferred_element_type=jnp.float32)
    h = h + bias_ref[0:1, :state_dim]

    # ---- LayerNorm(state_dim), nn.LayerNorm default eps ----
    mean = jnp.mean(h, axis=-1, keepdims=True)
    var = jnp.mean((h - mean) * (h - mean), axis=-1, keepdims=True)
    h = (h - mean) * jax.lax.rsqrt(var + ln_eps)
    h = h * bias_ref[1:2, :state_dim] + bias_ref[2:3, :state_dim]

    # ---- forward_trunk tanh ----
    h = jnp.tanh(h)

    # ---- pi MLP: [Linear, ReLU] * l, Linear, Tanh ----
    for i in range(n_pi):
        out_dim = pi_dims[i]
        h = jnp.dot(h, pi_w_refs[i][...], preferred_element_type=jnp.float32)
        h = h + bias_ref[3 + i:4 + i, :out_dim]
        if i < n_pi - 1:
            h = jnp.maximum(h, 0.0)                    # ReLU hidden activation
        else:
            h = jnp.tanh(h)                            # output_mod = nn.Tanh

    # lane-dense store: (TB, A_pad) with A_pad a multiple of 128
    mu_ref[...] = act_limit * h


def mlp_actor_forward(obs, params, *, act_limit=1.0, act_noise=0.1,
                      ln_eps=1e-5, with_logprob=True, batch_tile=512):
    """Matches MLPActor.forward(obs, deterministic=True, with_logprob=True).

    Returns (pi_action, log_pi, entropy) with shapes (B, A), (B, 1), (B,).
    """
    obs = obs.astype(jnp.float32)
    B, R = obs.shape
    w_tr = params["w_tr"].astype(jnp.float32)
    state_dim = w_tr.shape[1]
    pi_layers = params["pi"]
    n_pi = len(pi_layers)
    A = pi_layers[-1][0].shape[1]
    A_PAD = _round_up(A, LANE)

    # ---- pad the final layer's output columns to a lane-dense width ----
    pi_ws = [w.astype(jnp.float32) for w, _ in pi_layers]
    pi_bs = [b.astype(jnp.float32) for _, b in pi_layers]
    pi_ws[-1] = jnp.pad(pi_ws[-1], ((0, 0), (0, A_PAD - A)))
    pi_bs[-1] = jnp.pad(pi_bs[-1], (0, A_PAD - A))
    pi_dims = tuple(int(w.shape[1]) for w in pi_ws)

    # ---- pack all 1-row params into a single lane-aligned array ----
    rows = [params["b_tr"].astype(jnp.float32),
            params["gamma"].astype(jnp.float32),
            params["beta"].astype(jnp.float32)] + pi_bs
    pack_w = max(LANE, max(int(r.shape[0]) for r in rows))
    packed = jnp.stack(
        [jnp.pad(r, (0, pack_w - r.shape[0])) for r in rows], axis=0)

    # ---- batch tiling (software pipeline / megacore sharding) ----
    TB = min(int(batch_tile), _round_up(B, 8))
    B_pad = _round_up(B, TB)
    if B_pad != B:
        obs = jnp.pad(obs, ((0, B_pad - B), (0, 0)))
    grid = (B_pad // TB,)

    inputs = [obs, w_tr, packed] + pi_ws

    in_specs = [pl.BlockSpec((TB, R), lambda i: (i, 0))]
    for a in inputs[1:]:
        # full-array block, same index every step -> stays VMEM-resident
        in_specs.append(pl.BlockSpec(a.shape, lambda i: (0, 0)))

    out_shape = jax.ShapeDtypeStruct((B_pad, A_PAD), jnp.float32)
    out_spec = pl.BlockSpec((TB, A_PAD), lambda i: (i, 0))

    kernel = functools.partial(_mlp_actor_kernel, n_pi, float(act_limit),
                               float(ln_eps), state_dim, pi_dims)

    mu_pad = pl.pallas_call(
        kernel,
        out_shape=out_shape,
        grid=grid,
        in_specs=in_specs,
        out_specs=out_spec,
        compiler_params=pltpu.CompilerParams(
            dimension_semantics=("parallel",)),
    )(*inputs)

    mu = mu_pad[:B, :A]
    pi_action = mu  # deterministic: TruncatedNormal(mu, sigma).mean == mu

    if not with_logprob:
        return pi_action

    # Deterministic path: log_prob(mu) and entropy of Normal(mu, act_noise) are
    # data-independent constants -> computed outside the kernel.
    # TODO(synk): stochastic sampling (clipped Gaussian noise) and the
    #             truncation normalizer of TruncatedNormal are not implemented;
    #             only the deterministic=True path is computed here.
    log_sigma = math.log(act_noise)
    lp_per_dim = -log_sigma - 0.5 * math.log(2.0 * math.pi)
    ent_per_dim = 0.5 + 0.5 * math.log(2.0 * math.pi) + log_sigma
    log_pi = jnp.full((B, 1), A * lp_per_dim, jnp.float32)
    entropy = jnp.full((B,), A * ent_per_dim, jnp.float32)
    return pi_action, log_pi, entropy


def init_params(key, repr_dim, state_dim, hidden_dim, action_dim, l):
    """Deterministic synthetic parameters (shapes mirror MLPActor.__init__)."""
    keys = jax.random.split(key, 2 * (l + 2))
    ki = iter(range(len(keys)))

    def linear(kw, kb, fan_in, fan_out):
        s = 1.0 / math.sqrt(fan_in)
        w = jax.random.uniform(kw, (fan_in, fan_out), jnp.float32, -s, s)
        b = jax.random.uniform(kb, (fan_out,), jnp.float32, -s, s)
        return w, b

    w_tr, b_tr = linear(keys[next(ki)], keys[next(ki)], repr_dim, state_dim)
    gamma = jnp.ones((state_dim,), jnp.float32)
    beta = jnp.zeros((state_dim,), jnp.float32)

    pi = []
    dims = [state_dim] + [hidden_dim] * l + [action_dim]
    for i in range(l + 1):
        pi.append(linear(keys[next(ki)], keys[next(ki)], dims[i], dims[i + 1]))

    return {"w_tr": w_tr, "b_tr": b_tr, "gamma": gamma, "beta": beta, "pi": pi}


def _reference_forward(obs, params, act_limit, act_noise, ln_eps):
    """Pure-JAX reference for correctness checking (deterministic path)."""
    h = obs @ params["w_tr"] + params["b_tr"]
    mean = h.mean(-1, keepdims=True)
    var = ((h - mean) ** 2).mean(-1, keepdims=True)
    h = (h - mean) / jnp.sqrt(var + ln_eps)
    h = h * params["gamma"] + params["beta"]
    h = jnp.tanh(h)
    n = len(params["pi"])
    for i, (w, b) in enumerate(params["pi"]):
        h = h @ w + b
        h = jnp.maximum(h, 0.0) if i < n - 1 else jnp.tanh(h)
    mu = act_limit * h
    A = mu.shape[-1]
    lp = jnp.full((mu.shape[0], 1),
                  A * (-math.log(act_noise) - 0.5 * math.log(2 * math.pi)))
    ent = jnp.full((mu.shape[0],),
                   A * (0.5 + 0.5 * math.log(2 * math.pi) + math.log(act_noise)))
    return mu, lp, ent


if __name__ == "__main__":
    # Small shapes consistent with the module:
    # repr_dim=32, encoder_feature_dim(state_dim)=32, hidden_dim=32,
    # action_shape=(4,), l=2 hidden layers, act_limit=1.0, act_noise=0.1.
    B, REPR, STATE, HIDDEN, ACTION, L = 8, 32, 32, 32, 4, 2
    ACT_LIMIT, ACT_NOISE = 1.0, 0.1

    key = jax.random.PRNGKey(0)
    k_obs, k_par = jax.random.split(key)
    obs = jax.random.normal(k_obs, (B, REPR), jnp.float32)
    params = init_params(k_par, REPR, STATE, HIDDEN, ACTION, L)

    mu, log_pi, ent = mlp_actor_forward(
        obs, params, act_limit=ACT_LIMIT, act_noise=ACT_NOISE)
    jax.block_until_ready((mu, log_pi, ent))

    mu_ref, lp_ref, ent_ref = _reference_forward(
        obs, params, ACT_LIMIT, ACT_NOISE, 1e-5)
    assert mu.shape == (B, ACTION) and log_pi.shape == (B, 1) and ent.shape == (B,)
    assert jnp.allclose(mu, mu_ref, atol=1e-5, rtol=1e-5)
    assert jnp.allclose(log_pi, lp_ref, atol=1e-5, rtol=1e-5)
    assert jnp.allclose(ent, ent_ref, atol=1e-5, rtol=1e-5)

    print("KERNEL_OK")
</pallas_src>

<mosaic_0001>
module attributes {stable_mosaic.version = 11 : i64} {
  func.func @_mlp_actor_kernel(%arg0: i32, %arg1: memref<8x32xf32, #tpu.memory_space<vmem>>, %arg2: memref<32x32xf32, #tpu.memory_space<vmem>>, %arg3: memref<6x128xf32, #tpu.memory_space<vmem>>, %arg4: memref<32x32xf32, #tpu.memory_space<vmem>>, %arg5: memref<32x32xf32, #tpu.memory_space<vmem>>, %arg6: memref<32x128xf32, #tpu.memory_space<vmem>>, %arg7: memref<8x128xf32, #tpu.memory_space<vmem>>) attributes {dimension_semantics = [#tpu.dimension_semantics<parallel>], iteration_bounds = array<i64: 1>, scalar_prefetch = 0 : i64, scratch_operands = 0 : i64, tpu.core_type = #tpu.core_type<tc>, window_params = [{transform_indices = @transform_0, window_bounds = array<i64: 8, 32>}, {pipeline_mode = #tpu.pipeline_mode<synchronous>, transform_indices = @transform_1, window_bounds = array<i64: 32, 32>}, {pipeline_mode = #tpu.pipeline_mode<synchronous>, transform_indices = @transform_2, window_bounds = array<i64: 6, 128>}, {pipeline_mode = #tpu.pipeline_mode<synchronous>, transform_indices = @transform_3, window_bounds = array<i64: 32, 32>}, {pipeline_mode = #tpu.pipeline_mode<synchronous>, transform_indices = @transform_4, window_bounds = array<i64: 32, 32>}, {pipeline_mode = #tpu.pipeline_mode<synchronous>, transform_indices = @transform_5, window_bounds = array<i64: 32, 128>}, {transform_indices = @transform_6, window_bounds = array<i64: 8, 128>}]} {
    %c0 = arith.constant 0 : index
    %c0_0 = arith.constant 0 : index
    %0 = vector.load %arg1[%c0, %c0_0] : memref<8x32xf32, #tpu.memory_space<vmem>>, vector<8x32xf32>
    %c0_1 = arith.constant 0 : index
    %c0_2 = arith.constant 0 : index
    %1 = vector.load %arg2[%c0_1, %c0_2] : memref<32x32xf32, #tpu.memory_space<vmem>>, vector<32x32xf32>
    %cst = arith.constant dense<0.000000e+00> : vector<8x32xf32>
    %2 = tpu.matmul %0, %1, %cst {dimension_numbers = #tpu.dot_dimension_numbers<[1], [0], [0], [1], [0, 0, 1, 1], [], []>} : vector<8x32xf32>, vector<32x32xf32>, vector<8x32xf32> -> vector<8x32xf32>
    %c0_3 = arith.constant 0 : index
    %c0_4 = arith.constant 0 : index
    %3 = vector.load %arg3[%c0_3, %c0_4] : memref<6x128xf32, #tpu.memory_space<vmem>>, vector<1x32xf32>
    %4 = vector.broadcast %3 : vector<1x32xf32> to vector<8x32xf32>
    %5 = arith.addf %2, %4 : vector<8x32xf32>
    %cst_5 = arith.constant dense<0.000000e+00> : vector<8xf32>
    %6 = vector.multi_reduction <add>, %5, %cst_5 [1] : vector<8x32xf32> to vector<8xf32>
    %7 = vector.shape_cast %6 : vector<8xf32> to vector<8x1xf32>
    %cst_6 = arith.constant 3.200000e+01 : f32
    %8 = vector.broadcast %cst_6 : f32 to vector<8x1xf32>
    %9 = arith.divf %7, %8 : vector<8x1xf32>
    %10 = vector.broadcast %9 : vector<8x1xf32> to vector<8x32xf32>
    %11 = arith.subf %5, %10 : vector<8x32xf32>
    %12 = vector.broadcast %9 : vector<8x1xf32> to vector<8x32xf32>
    %13 = arith.subf %5, %12 : vector<8x32xf32>
    %14 = arith.mulf %11, %13 : vector<8x32xf32>
    %cst_7 = arith.constant dense<0.000000e+00> : vector<8xf32>
    %15 = vector.multi_reduction <add>, %14, %cst_7 [1] : vector<8x32xf32> to vector<8xf32>
    %16 = vector.shape_cast %15 : vector<8xf32> to vector<8x1xf32>
    %cst_8 = arith.constant 3.200000e+01 : f32
    %17 = vector.broadcast %cst_8 : f32 to vector<8x1xf32>
    %18 = arith.divf %16, %17 : vector<8x1xf32>
    %19 = vector.broadcast %9 : vector<8x1xf32> to vector<8x32xf32>
    %20 = arith.subf %5, %19 : vector<8x32xf32>
    %cst_9 = arith.constant 9.99999974E-6 : f32
    %21 = vector.broadcast %cst_9 : f32 to vector<8x1xf32>
    %22 = arith.addf %18, %21 : vector<8x1xf32>
    %23 = math.rsqrt %22 : vector<8x1xf32>
    %24 = vector.broadcast %23 : vector<8x1xf32> to vector<8x32xf32>
    %25 = arith.mulf %20, %24 : vector<8x32xf32>
    %c1 = arith.constant 1 : index
    %c0_10 = arith.constant 0 : index
    %26 = vector.load %arg3[%c1, %c0_10] : memref<6x128xf32, #tpu.memory_space<vmem>>, vector<1x32xf32>
    %27 = vector.broadcast %26 : vector<1x32xf32> to vector<8x32xf32>
    %28 = arith.mulf %25, %27 : vector<8x32xf32>
    %c2 = arith.constant 2 : index
    %c0_11 = arith.constant 0 : index
    %29 = vector.load %arg3[%c2, %c0_11] : memref<6x128xf32, #tpu.memory_space<vmem>>, vector<1x32xf32>
    %30 = vector.broadcast %29 : vector<1x32xf32> to vector<8x32xf32>
    %31 = arith.addf %28, %30 : vector<8x32xf32>
    %32 = math.tanh %31 : vector<8x32xf32>
    %c0_12 = arith.constant 0 : index
    %c0_13 = arith.constant 0 : index
    %33 = vector.load %arg4[%c0_12, %c0_13] : memref<32x32xf32, #tpu.memory_space<vmem>>, vector<32x32xf32>
    %cst_14 = arith.constant dense<0.000000e+00> : vector<8x32xf32>
    %34 = tpu.matmul %32, %33, %cst_14 {dimension_numbers = #tpu.dot_dimension_numbers<[1], [0], [0], [1], [0, 0, 1, 1], [], []>} : vector<8x32xf32>, vector<32x32xf32>, vector<8x32xf32> -> vector<8x32xf32>
    %c3 = arith.constant 3 : index
    %c0_15 = arith.constant 0 : index
    %35 = vector.load %arg3[%c3, %c0_15] : memref<6x128xf32, #tpu.memory_space<vmem>>, vector<1x32xf32>
    %36 = vector.broadcast %35 : vector<1x32xf32> to vector<8x32xf32>
    %37 = arith.addf %34, %36 : vector<8x32xf32>
    %cst_16 = arith.constant 0.000000e+00 : f32
    %38 = vector.broadcast %cst_16 : f32 to vector<8x32xf32>
    %39 = arith.maximumf %37, %38 : vector<8x32xf32>
    %c0_17 = arith.constant 0 : index
    %c0_18 = arith.constant 0 : index
    %40 = vector.load %arg5[%c0_17, %c0_18] : memref<32x32xf32, #tpu.memory_space<vmem>>, vector<32x32xf32>
    %cst_19 = arith.constant dense<0.000000e+00> : vector<8x32xf32>
    %41 = tpu.matmul %39, %40, %cst_19 {dimension_numbers = #tpu.dot_dimension_numbers<[1], [0], [0], [1], [0, 0, 1, 1], [], []>} : vector<8x32xf32>, vector<32x32xf32>, vector<8x32xf32> -> vector<8x32xf32>
    %c4 = arith.constant 4 : index
    %c0_20 = arith.constant 0 : index
    %42 = vector.load %arg3[%c4, %c0_20] : memref<6x128xf32, #tpu.memory_space<vmem>>, vector<1x32xf32>
    %43 = vector.broadcast %42 : vector<1x32xf32> to vector<8x32xf32>
    %44 = arith.addf %41, %43 : vector<8x32xf32>
    %cst_21 = arith.constant 0.000000e+00 : f32
    %45 = vector.broadcast %cst_21 : f32 to vector<8x32xf32>
    %46 = arith.maximumf %44, %45 : vector<8x32xf32>
    %c0_22 = arith.constant 0 : index
    %c0_23 = arith.constant 0 : index
    %47 = vector.load %arg6[%c0_22, %c0_23] : memref<32x128xf32, #tpu.memory_space<vmem>>, vector<32x128xf32>
    %cst_24 = arith.constant dense<0.000000e+00> : vector<8x128xf32>
    %48 = tpu.matmul %46, %47, %cst_24 {dimension_numbers = #tpu.dot_dimension_numbers<[1], [0], [0], [1], [0, 0, 1, 1], [], []>} : vector<8x32xf32>, vector<32x128xf32>, vector<8x128xf32> -> vector<8x128xf32>
    %c5 = arith.constant 5 : index
    %c0_25 = arith.constant 0 : index
    %49 = vector.load %arg3[%c5, %c0_25] : memref<6x128xf32, #tpu.memory_space<vmem>>, vector<1x128xf32>
    %50 = vector.broadcast %49 : vector<1x128xf32> to vector<8x128xf32>
    %51 = arith.addf %48, %50 : vector<8x128xf32>
    %52 = math.tanh %51 : vector<8x128xf32>
    %cst_26 = arith.constant 1.000000e+00 : f32
    %53 = vector.broadcast %cst_26 : f32 to vector<8x128xf32>
    %54 = arith.mulf %53, %52 : vector<8x128xf32>
    %c0_27 = arith.constant 0 : index
    %c0_28 = arith.constant 0 : index
    %55 = vector.load %arg7[%c0_27, %c0_28] : memref<8x128xf32, #tpu.memory_space<vmem>>, vector<8x128xf32>
    tpu.vector_store %arg7[%c0_27, %c0_28], %54 {strides = array<i32>} : memref<8x128xf32, #tpu.memory_space<vmem>>, vector<8x128xf32>,
    return
  }
  func.func @transform_0(%arg0: i32) -> (i32, i32) {
    %c0_i32 = arith.constant 0 : i32
    %c0_i32_0 = arith.constant 0 : i32
    return %arg0, %c0_i32 : i32, i32
  }
  func.func @transform_1(%arg0: i32) -> (i32, i32) {
    %c0_i32 = arith.constant 0 : i32
    %c0_i32_0 = arith.constant 0 : i32
    %c0_i32_1 = arith.constant 0 : i32
    return %c0_i32, %c0_i32_0 : i32, i32
  }
  func.func @transform_2(%arg0: i32) -> (i32, i32) {
    %c0_i32 = arith.constant 0 : i32
    %c0_i32_0 = arith.constant 0 : i32
    %c0_i32_1 = arith.constant 0 : i32
    return %c0_i32, %c0_i32_0 : i32, i32
  }
  func.func @transform_3(%arg0: i32) -> (i32, i32) {
    %c0_i32 = arith.constant 0 : i32
    %c0_i32_0 = arith.constant 0 : i32
    %c0_i32_1 = arith.constant 0 : i32
    return %c0_i32, %c0_i32_0 : i32, i32
  }
  func.func @transform_4(%arg0: i32) -> (i32, i32) {
    %c0_i32 = arith.constant 0 : i32
    %c0_i32_0 = arith.constant 0 : i32
    %c0_i32_1 = arith.constant 0 : i32
    return %c0_i32, %c0_i32_0 : i32, i32
  }
  func.func @transform_5(%arg0: i32) -> (i32, i32) {
    %c0_i32 = arith.constant 0 : i32
    %c0_i32_0 = arith.constant 0 : i32
    %c0_i32_1 = arith.constant 0 : i32
    return %c0_i32, %c0_i32_0 : i32, i32
  }
  func.func @transform_6(%arg0: i32) -> (i32, i32) {
    %c0_i32 = arith.constant 0 : i32
    %c0_i32_0 = arith.constant 0 : i32
    return %arg0, %c0_i32 : i32, i32
  }
}

</mosaic_0001>

<bundles_post_ra>
// kernel: tpu_custom_call.1
= control target key start
LH: loop header
LB: loop body
LE: loop exit
PB: predicated region body
PF: predicated region fallthrough
CT: control target
= control target key end

     0   :  { %11 = vsyncpa [#allocation3], 0  ;;  %s922_s0 = inlined_call_operand.hbm [shape: f32[8,32], index: 0, kind: input, shape index: {}]   ;;  %s923_s1 = inlined_call_operand.hbm [shape: f32[32,32], index: 1, kind: input, shape index: {}]   ;;  %s924_s2 = inlined_call_operand.hbm [shape: f32[6,128], index: 2, kind: input, shape index: {}]   ;;  %s925_s3 = inlined_call_operand.hbm [shape: f32[32,32], index: 3, kind: input, shape index: {}]   ;;  %s926_s4 = inlined_call_operand.hbm [shape: f32[32,32], index: 4, kind: input, shape index: {}]   ;;  %s927_s5 = inlined_call_operand.hbm [shape: f32[32,128], index: 5, kind: input, shape index: {}]   ;;  %s928_s6 = inlined_call_operand.hbm [shape: f32[8,128], index: 6, kind: output, shape index: {}]  }
   0x1   :  { %12 = vsyncpa [#allocation6], 0 }
   0x2   :  { %13 = vsyncpa [#allocation9], 0 }
   0x3   :  { %14 = vsyncpa [#allocation12], 0 }
   0x4   :  { %15 = vsyncpa [#allocation4], 0  ;;  %s761_s21 = smov [#allocation5]   ;;  %s597_s25 = scalar_lea.hbm %s923_s1, 512 }
   0x5   :  { %s31_s22 = sshll.u32 %s761_s21, 4  ;;  %p598_p0 = scmp.ne.s32.totalorder %s923_s1, %s597_s25  ;;  %s32_s22 = int_to_ptr.vmem [resolvable:$true] %s31_s22 }
   0x6   :  { %p601_p1 = scmp.lt.u32.totalorder %s597_s25, %s923_s1 }
   0x8   :  { %p603_p2 = pnand %p601_p1, %p598_p0 }
   0xa   :  { %606 = shalt.err (!%p603_p2)
}
   0xb   :  { %s607_s30 = scalar_lea.vmem %s32_s22, 512  ;;  %p612_p4 = scmp.lt.s32.totalorder %s32_s22, %s32_s22 }
   0xc   :  { %p608_p3 = scmp.ne.s32.totalorder %s32_s22, %s607_s30  ;;  %p613_p5 = scmp.lt.s32.totalorder %s607_s30, %s607_s30 }
   0xe   :  { %p614_p6 = por %p613_p5, %p612_p4 }
  0x10   :  { %p615_p7 = pnand %p614_p6, %p608_p3 }
  0x12   :  { %618 = shalt.err (!%p615_p7)
}
  0x13   :  { %s762_s7 = smov 128   ;;  %s763_s8 = smov 8  }
  0x14   :  { %37 = dma.hbm_to_vmem [thread:$0]  %s923_s1, 512, %s32_s22, [#allocation6], %s762_s7, %s762_s7, %s763_s8  }
  0x15   :  { %s764_s11 = smov [#allocation8]   ;;  %s765_s13 = smov [#allocation2]  }
  0x16   :  { %s53_s12 = sshll.u32 %s764_s11, 4  ;;  %s22_s14 = sshll.u32 %s765_s13, 4  ;;  %s54_s12 = int_to_ptr.vmem [resolvable:$true] %s53_s12  ;;  %s23_s14 = int_to_ptr.vmem [resolvable:$true] %s22_s14 }
  0x17   :  { %s619_s17 = scalar_lea.hbm %s925_s3, 512 }
  0x18   :  { %p620_p8 = scmp.ne.s32.totalorder %s925_s3, %s619_s17  ;;  %p623_p9 = scmp.lt.u32.totalorder %s619_s17, %s925_s3 }
  0x1a   :  { %p625_p10 = pnand %p623_p9, %p620_p8 }
  0x1c   :  { %628 = shalt.err (!%p625_p10)
}
  0x1d   :  { %s629_s1 = scalar_lea.vmem %s54_s12, 512  ;;  %p634_p12 = scmp.lt.s32.totalorder %s54_s12, %s54_s12 }
  0x1e   :  { %p630_p11 = scmp.ne.s32.totalorder %s54_s12, %s629_s1  ;;  %p635_p13 = scmp.lt.s32.totalorder %s629_s1, %s629_s1 }
  0x20   :  { %p636_p0 = por %p635_p13, %p634_p12 }
  0x22   :  { %p637_p1 = pnand %p636_p0, %p630_p11 }
  0x24   :  { %640 = shalt.err (!%p637_p1)
}
  0x25   :  { %59 = dma.hbm_to_vmem [thread:$0]  %s925_s3, 512, %s54_s12, [#allocation9], %s762_s7, %s762_s7, %s763_s8  }
  0x26   :  { %s641_s26 = scalar_lea.hbm %s922_s0, 128 }
  0x27   :  { %p642_p2 = scmp.ne.s32.totalorder %s922_s0, %s641_s26  ;;  %p645_p3 = scmp.lt.u32.totalorder %s641_s26, %s922_s0 }
  0x29   :  { %p647_p4 = pnand %p645_p3, %p642_p2 }
  0x2b   :  { %650 = shalt.err (!%p647_p4)
}
  0x2c   :  { %s651_s9 = scalar_lea.vmem %s23_s14, 128  ;;  %p656_p6 = scmp.lt.s32.totalorder %s23_s14, %s23_s14 }
  0x2d   :  { %p652_p5 = scmp.ne.s32.totalorder %s23_s14, %s651_s9  ;;  %p657_p7 = scmp.lt.s32.totalorder %s651_s9, %s651_s9 }
  0x2f   :  { %p658_p8 = por %p657_p7, %p656_p6 }
  0x31   :  { %p659_p9 = pnand %p658_p8, %p652_p5 }
  0x33   :  { %662 = shalt.err (!%p659_p9)
}
  0x34   :  { %25 = dma.hbm_to_vmem [thread:$0]  %s922_s0, 128, %s23_s14, [#allocation3]  }
  0x35   :  { %s766_s11 = smov [#allocation7]   ;;  %s767_s13 = smov [#allocation10]  }
  0x36   :  { %s44_s12 = sshll.u32 %s766_s11, 4  ;;  %s65_s15 = sshll.u32 %s767_s13, 4  ;;  %s45_s12 = int_to_ptr.vmem [resolvable:$true] %s44_s12  ;;  %s66_s15 = int_to_ptr.vmem [resolvable:$true] %s65_s15 }
  0x37   :  { %s663_s18 = scalar_lea.hbm %s924_s2, 128 }
  0x38   :  { %p664_p10 = scmp.ne.s32.totalorder %s924_s2, %s663_s18  ;;  %p667_p11 = scmp.lt.u32.totalorder %s663_s18, %s924_s2 }
  0x3a   :  { %p669_p12 = pnand %p667_p11, %p664_p10 }
  0x3c   :  { %672 = shalt.err (!%p669_p12)
}
  0x3d   :  { %s673_s0 = scalar_lea.vmem %s45_s12, 128  ;;  %p678_p0 = scmp.lt.s32.totalorder %s45_s12, %s45_s12 }
  0x3e   :  { %p674_p13 = scmp.ne.s32.totalorder %s45_s12, %s673_s0  ;;  %p679_p1 = scmp.lt.s32.totalorder %s673_s0, %s673_s0 }
  0x40   :  { %p680_p2 = por %p679_p1, %p678_p0 }
  0x42   :  { %p681_p3 = pnand %p680_p2, %p674_p13 }
  0x44   :  { %684 = shalt.err (!%p681_p3)
}
  0x45   :  { %47 = dma.hbm_to_vmem [thread:$0]  %s924_s2, 128, %s45_s12, [#allocation6]  }
  0x46   :  { %s685_s25 = scalar_lea.hbm %s926_s4, 512 }
  0x47   :  { %p686_p4 = scmp.ne.s32.totalorder %s926_s4, %s685_s25  ;;  %p689_p5 = scmp.lt.u32.totalorder %s685_s25, %s926_s4 }
  0x49   :  { %p691_p6 = pnand %p689_p5, %p686_p4 }
  0x4b   :  { %694 = shalt.err (!%p691_p6)
}
  0x4c   :  { %s695_s30 = scalar_lea.vmem %s66_s15, 512  ;;  %p700_p8 = scmp.lt.s32.totalorder %s66_s15, %s66_s15 }
  0x4d   :  { %p696_p7 = scmp.ne.s32.totalorder %s66_s15, %s695_s30  ;;  %p701_p9 = scmp.lt.s32.totalorder %s695_s30, %s695_s30 }
  0x4f   :  { %p702_p10 = por %p701_p9, %p700_p8 }
  0x51   :  { %p703_p11 = pnand %p702_p10, %p696_p7 }
  0x53   :  { %706 = shalt.err (!%p703_p11)
}
  0x54   :  { %71 = dma.hbm_to_vmem [thread:$0]  %s926_s4, 512, %s66_s15, [#allocation9], %s762_s7, %s762_s7, %s763_s8  }
  0x55   :  { %s768_s3 = smov [#allocation11]   ;;  %s707_s13 = scalar_lea.hbm %s927_s5, 512 }
  0x56   :  { %s77_s10 = sshll.u32 %s768_s3, 4  ;;  %p708_p12 = scmp.ne.s32.totalorder %s927_s5, %s707_s13  ;;  %s78_s10 = int_to_ptr.vmem [resolvable:$true] %s77_s10 }
  0x57   :  { %p711_p13 = scmp.lt.u32.totalorder %s707_s13, %s927_s5 }
  0x59   :  { %p713_p0 = pnand %p711_p13, %p708_p12 }
  0x5b   :  { %716 = shalt.err (!%p713_p0)
}
  0x5c   :  { %s717_s20 = scalar_lea.vmem %s78_s10, 512  ;;  %p722_p2 = scmp.lt.s32.totalorder %s78_s10, %s78_s10 }
  0x5d   :  { %p718_p1 = scmp.ne.s32.totalorder %s78_s10, %s717_s20  ;;  %p723_p3 = scmp.lt.s32.totalorder %s717_s20, %s717_s20 }
  0x5f   :  { %p724_p4 = por %p723_p3, %p722_p2 }
  0x61   :  { %p725_p5 = pnand %p724_p4, %p718_p1 }
  0x63   :  { %728 = shalt.err (!%p725_p5)
}
  0x64   :  { %83 = dma.hbm_to_vmem [thread:$0]  %s927_s5, 512, %s78_s10, [#allocation12], %s762_s7, %s762_s7, %s763_s8  }
  0x65   :  { %751 = dma.done.wait [#allocation3], 128  }
  0x66   :  { %752 = vsyncadd [#allocation3], 4294967168 }
  0x67   :  { %753 = dma.done.wait [#allocation6], 640  }
  0x68   :  { %754 = vsyncadd [#allocation6], 4294966656 }
  0x69   :  { %755 = dma.done.wait [#allocation9], 1024  }
  0x6a   :  { %756 = vsyncadd [#allocation9], 4294966272 }
  0x6b   :  { %757 = dma.done.wait [#allocation12], 512  }
  0x6c   :  { %758 = vsyncadd [#allocation12], 4294966784  ;;  %v769_v0 = vmov 0.0|0.0   ;;  %vm770_vm0 = vmmov 0   ;;  %v771_v1 = vmov 0.0   ;;  %v103_v2 = vld [vmem:[#allocation5] sm:$0xff] }
  0x6d   :  { %555 = vmatprep.subr.bf16.mxu0 %v769_v0  ;;  %519 = vmatprep.mubr.msk.f32.mxu0 %vm770_vm0, %v771_v1  ;;  %v104_v3 = vld [vmem:[#allocation5 + $0x8] sm:$0xff]  ;;  %v105_v4 = vld [vmem:[#allocation5 + $0x10] sm:$0xff]  ;;  %v106_v6 = vld [vmem:[#allocation5 + $0x18] sm:$0xff]  ;;  %vm112_vm1 = vcmask 261120   ;;  %s772_s5 = smov [#allocation13]  }
  0x6e   :  { %561 = vmatprep.subr.bf16.mxu1 %v769_v0  ;;  %530 = vmatprep.mubr.msk.f32.mxu1 %vm770_vm0, %v771_v1  ;;  %v556_v5 = vpack.c.bf16 %v104_v3, %v103_v2  ;;  %v559_v7 = vpack.c.bf16 %v106_v6, %v105_v4  ;;  %v102_v8 = vld [vmem:[#allocation2] sm:$0xff]  ;;  %v481_v9 = vld [vmem:[#allocation7] ss:$0 sm:$0xff]  ;;  %v213_v19 = vld [vmem:[#allocation8] sm:$0xff]  ;;  %s469_s7 = sshll.u32 %s772_s5, 4  ;;  %s470_s7 = int_to_ptr.vmem [resolvable:$true] %s469_s7 }
  0x6f   :  { %v214_v20 = vld [vmem:[#allocation8 + $0x8] sm:$0xff]  ;;  %v215_v21 = vld [vmem:[#allocation8 + $0x10] sm:$0xff]  ;;  %v216_v23 = vld [vmem:[#allocation8 + $0x18] sm:$0xff]  ;;  %s729_s8 = scalar_lea.vmem %s470_s7, 128  ;;  %p734_p7 = scmp.lt.s32.totalorder %s470_s7, %s470_s7 }
  0x70   :  { %557 = vmatpush3.bf16.msra.mxu0 %v556_v5  ;;  %v562_v22 = vpack.c.bf16 %v214_v20, %v213_v19  ;;  %v565_v24 = vpack.c.bf16 %v216_v23, %v215_v21  ;;  %v296_v25 = vld [vmem:[#allocation10] sm:$0xff]  ;;  %v297_v26 = vld [vmem:[#allocation10 + $0x8] sm:$0xff]  ;;  %v483_v32 = vld [vmem:[#allocation7 + $0x1] ss:$0 sm:$0xff]  ;;  %p730_p6 = scmp.ne.s32.totalorder %s470_s7, %s729_s8  ;;  %p735_p8 = scmp.lt.s32.totalorder %s729_s8, %s729_s8 }
  0x71   :  { %558 = vmatprep.subr.bf16.mxu0 %v769_v0  ;;  %v568_v27 = vpack.c.bf16 %v297_v26, %v296_v25  ;;  %v484_v34 = vld [vmem:[#allocation7 + $0x2] ss:$0 sm:$0xff]  ;;  %v298_v38 = vld [vmem:[#allocation10 + $0x10] sm:$0xff]  ;;  %v379_v41 = vld [vmem:[#allocation11] sm:$0xff] }
  0x72   :  { %563 = vmatpush3.bf16.msra.mxu1 %v562_v22  ;;  %v299_v39 = vld [vmem:[#allocation10 + $0x18] sm:$0xff]  ;;  %v380_v42 = vld [vmem:[#allocation11 + $0x8] sm:$0xff]  ;;  %v381_v49 = vld [vmem:[#allocation11 + $0x10] sm:$0xff]  ;;  %p736_p9 = por %p735_p8, %p734_p7 }
  0x73   :  { %564 = vmatprep.subr.bf16.mxu1 %v769_v0  ;;  %v571_v40 = vpack.c.bf16 %v299_v39, %v298_v38  ;;  %v574_v43 = vpack.c.bf16 %v380_v42, %v379_v41  ;;  %v485_v44 = vld [vmem:[#allocation7 + $0x3] ss:$0 sm:$0xff]  ;;  %v487_v52 = vld [vmem:[#allocation7 + $0x4] ss:$0 sm:$0xff]  ;;  %v489_v57 = vld [vmem:[#allocation7 + $0x5] ss:$0 sm:$0xff] }
  0x74   :  { %560 = vmatpush3.bf16.msra.mxu0 %v559_v7  ;;  %v382_v50 = vld [vmem:[#allocation11 + $0x18] sm:$0xff]  ;;  %p737_p10 = pnand %p736_p9, %p730_p6 }
  0x75   :  { %567 = vmatprep.subr.bf16.mxu0 %v769_v0  ;;  %v577_v51 = vpack.c.bf16 %v382_v50, %v381_v49 }
  0x76   :  { %566 = vmatpush3.bf16.msra.mxu1 %v565_v24 }
  0x77   :  { %520 = vmatmul.mubr.msk.f32.vlgmr.msra.gmra.mrb[0].mxu0 %vm112_vm1, %v102_v8  ;;  %573 = vmatprep.subr.bf16.mxu1 %v769_v0 }
  0x78   :  { %541 = vmatprep.mubr.msk.f32.mxu0 %vm770_vm0, %v771_v1  ;;  %569 = vmatpush3.bf16.msra.mxu0 %v568_v27 }
  0x79   :  { %570 = vmatprep.subr.bf16.mxu0 %v769_v0 }
  0x7c   :  { %572 = vmatpush3.bf16.msra.mxu0 %v571_v40 }
 0x14a   :  { %v182_v10 = vpop.f32.mrb[0].mxu0 }
 0x14b   :  { %v183_v11 = vadd.f32 %v481_v9, %v182_v10  ;;  %v521_v12 = vpop.f32.mrb[1].mxu0 }
 0x14d   :  { %v186_v13 = vsel %vm112_vm1, %v183_v11, 0.0 }
 0x14e   :  { %187 = vadd.xlane.f32.xlu0 %v186_v13 }
 0x1db   :  { %v188_v14 = vpop.xlane.xlu0 %187 }
 0x1dc   :  { %v190_v15 = vmul.f32 0.03125, %v188_v14 }
 0x1de   :  { %v191_v16 = vsub.f32 %v183_v11, %v190_v15 }
 0x1e0   :  { %v192_v17 = vmul.f32 %v191_v16, %v191_v16 }
 0x1e2   :  { %v193_v18 = vsel %vm112_vm1, %v192_v17, 0.0 }
 0x1e3   :  { %194 = vadd.xlane.f32.xlu0 %v193_v18 }
 0x270   :  { %v195_v28 = vpop.xlane.xlu0 %194 }
 0x271   :  { %v196_v29 = vmul.f32 0.03125, %v195_v28 }
 0x273   :  { %v197_v30 = vadd.f32 1e-05, %v196_v29 }
 0x275   :  { %591 = vrsqrt.f32 %v197_v30 }
 0x27f   :  { %v592_v31 = vpop.eup %591 }
 0x280   :  { %v199_v33 = vmul.f32 %v592_v31, %v191_v16 }
 0x282   :  { %v205_v35 = vmul.f32 %v483_v32, %v199_v33 }
 0x284   :  { %v211_v36 = vadd.f32 %v484_v34, %v205_v35 }
 0x286   :  { %593 = vtanh.f32 %v211_v36 }
 0x290   :  { %v594_v37 = vpop.eup %593 }
 0x291   :  { %531 = vmatmul.mubr.msk.f32.vlgmr.msra.gmra.mrb[0].mxu1 %vm112_vm1, %v594_v37 }
 0x292   :  { %552 = vmatprep.mubr.msk.f32.mxu1 %vm770_vm0, %v771_v1  ;;  %575 = vmatpush3.bf16.msra.mxu1 %v574_v43 }
 0x293   :  { %576 = vmatprep.subr.bf16.mxu1 %v769_v0 }
 0x296   :  { %578 = vmatpush3.bf16.msra.mxu1 %v577_v51 }
 0x364   :  { %v291_v45 = vpop.f32.mrb[0].mxu1 }
 0x365   :  { %v292_v46 = vadd.f32 %v485_v44, %v291_v45  ;;  %v532_v47 = vpop.f32.mrb[1].mxu1 }
 0x367   :  { %v295_v48 = vmax.f32 %v292_v46, 0.0 }
 0x369   :  { %542 = vmatmul.mubr.msk.f32.vlgmr.msra.gmra.mrb[2].mxu0 %vm112_vm1, %v295_v48 }
 0x43c   :  { %v374_v53 = vpop.f32.mrb[2].mxu0 }
 0x43d   :  { %v375_v54 = vadd.f32 %v487_v52, %v374_v53  ;;  %v543_v55 = vpop.f32.mrb[3].mxu0 }
 0x43f   :  { %v378_v56 = vmax.f32 %v375_v54, 0.0 }
 0x441   :  { %553 = vmatmul.mubr.msk.f32.vlgmr.msra.gmra.mrb[2].mxu1 %vm112_vm1, %v378_v56 }
 0x514   :  { %v457_v58 = vpop.f32.mrb[2].mxu1 }
 0x515   :  { %v458_v59 = vadd.f32 %v489_v57, %v457_v58  ;;  %v554_v60 = vpop.f32.mrb[3].mxu1 }
 0x517   :  { %595 = vtanh.f32 %v458_v59 }
 0x521   :  { %v596_v61 = vpop.eup %595 }
 0x522   :  { %462 = vst [vmem:[#allocation13] sm:$0xff] %v596_v61 }
 0x523   :  { %740 = shalt.err (!%p737_p10)
}
 0x524   :  { %s741_s0 = scalar_lea.hbm %s928_s6, 128 }
 0x525   :  { %p742_p11 = scmp.ne.s32.totalorder %s928_s6, %s741_s0  ;;  %p745_p12 = scmp.lt.u32.totalorder %s741_s0, %s928_s6 }
 0x527   :  { %p747_p13 = pnand %p745_p12, %p742_p11 }
 0x529   :  { %750 = shalt.err (!%p747_p13)
}
 0x52a   :  { %472 = dma.vmem_to_hbm [thread:$0]  %s470_s7, 128, %s928_s6, [#allocation4]  }
 0x52b   :  { %759 = dma.done.wait [#allocation4], 128  }
 0x52c   :  { %760 = vsyncadd [#allocation4], 4294967168 }
 0x52d   :  { %476 = vsyncpa [#allocation3], 1 }
 0x52e   :  { %477 = vsyncpa [#allocation6], 1 }
 0x52f   :  { %478 = vsyncpa [#allocation9], 1 }
 0x530   :  { %479 = vsyncpa [#allocation12], 1 }
 0x531   :  { %480 = vsyncpa [#allocation4], 1 }

</bundles_post_ra>
